<compile_context>
chip_gen: v6e
topology: v6e:2x2x1
jax: 0.10.0
libtpu: 0.0.40
codegen_flags: <defaults>
</compile_context>

<pallas_src>
import functools

import jax
import jax.numpy as jnp
import numpy as np
from jax import lax
from jax.experimental import pallas as pl


def fused_kernel(x1_ref, w_ref, b_ref, x2_ref, o_ref, *, B, M):
    # ----- v1 = (x1 @ W^T + bias) * 1e-3  (Linear, torch weight layout) ------
    # dot_general contracting dim 1 of both operands == A @ B.T (no XLU
    # transpose).  The 1/1000 score scale is folded here (mathematically
    # identical to scaling the (B*M, N) score matrix, but half the elements).
    v1 = (
        lax.dot_general(
            x1_ref[...], w_ref[...],
            dimension_numbers=(((1,), (1,)), ((), ())),
            preferred_element_type=jnp.float32,
        )
        + b_ref[...]
    ) * (1.0 / 1000.0)                                  # (N, D)

    x2 = x2_ref[...]                                    # (B*M, D), loaded layout kept

    # ----- scores: one fused MXU push across all batches ----------------------
    # (B*M, D) contracted with (N, D) on the D axes -> (B*M, N)  == x2 @ v1.T
    s = lax.dot_general(
        x2, v1,
        dimension_numbers=(((1,), (1,)), ((), ())),
        preferred_element_type=jnp.float32,
    )

    # ----- stable softmax over the last axis ----------------------------------
    m = jnp.max(s, axis=-1, keepdims=True)
    e = jnp.exp(s - m)
    denom = jnp.sum(e, axis=-1, keepdims=True)
    p = e * pl.reciprocal(denom)                        # exact reciprocal (EUP)

    # TODO(synk): nn.Dropout(0.1) is the identity in eval/inference mode;
    # training-mode stochastic dropout (PyTorch RNG) is not reproduced here.

    # ----- v6[b] = p[b] @ x2[b], unrolled over B, lane-dense single store -----
    # Rows b*M .. (b+1)*M of p / x2 are batch b's (M, N) / (N, D) (M == N).
    # b*M is a multiple of 8, so every slice is sublane-aligned.
    outs = []
    for bidx in range(B):
        p_b = p[bidx * M:(bidx + 1) * M, :]             # (M, N)
        x2_b = x2[bidx * M:(bidx + 1) * M, :]           # (N, D)
        outs.append(
            jnp.dot(p_b, x2_b, preferred_element_type=jnp.float32)
        )                                               # (M, D)
    # Concatenate along lanes -> (M, B*D) = (16, 128): one unmasked vst block.
    o_ref[...] = jnp.concatenate(outs, axis=1).astype(o_ref.dtype)


def model_forward(x1, w, b, x2):
    N, D = x1.shape
    B, M, D2 = x2.shape
    assert D2 == D and M == N, "forward requires x2 feature dim == D and M == N"
    b2 = b.reshape(1, D)
    # Wrapper-side flatten of the contiguous HBM array is free and avoids an
    # in-kernel reshape (which is not a view and can force VMEM relayouts).
    x2_flat = x2.reshape(B * M, D)

    kernel = functools.partial(fused_kernel, B=B, M=M)

    # Single invocation (grid=()), whole arrays as one VMEM block each (every
    # block shape equals the full array dims, so the (8,128) block constraint
    # does not apply).  Output is a lane-dense (M, B*D) slab.
    out_slab = pl.pallas_call(
        kernel,
        out_shape=jax.ShapeDtypeStruct((M, B * D), jnp.float32),
        in_specs=[
            pl.BlockSpec((N, D), lambda: (0, 0)),          # x1 (full)
            pl.BlockSpec((D, D), lambda: (0, 0)),          # W  (full, torch layout)
            pl.BlockSpec((1, D), lambda: (0, 0)),          # bias
            pl.BlockSpec((B * M, D), lambda: (0, 0)),      # x2, pre-flattened
        ],
        out_specs=pl.BlockSpec((M, B * D), lambda: (0, 0)),
    )(x1, w, b2, x2_flat)

    # out_slab[:, b*D:(b+1)*D] holds batch b's (M, D) result; restore (B, M, D).
    return out_slab.reshape(M, B, D).transpose(1, 0, 2)


def reference_forward(x1, w, b, x2):
    v1 = x1 @ w.T + b
    v2 = jnp.einsum("bmd,nd->bmn", x2, v1)
    v3 = v2 / 1000.0
    v4 = jax.nn.softmax(v3, axis=-1)
    v6 = jnp.einsum("bmn,bnd->bmd", v4, x2)  # valid since N == M
    return v6


if __name__ == "__main__":
    N, D, B = 16, 32, 4
    M = N  # required for the final matmul (softmax @ x2) to be well-defined

    key = jax.random.PRNGKey(0)
    k1, k2, kw, kb = jax.random.split(key, 4)

    x1 = jax.random.normal(k1, (N, D), dtype=jnp.float32)
    x2 = jax.random.normal(k2, (B, M, D), dtype=jnp.float32)

    # deterministic nn.Linear(D, D)-style params
    bound = 1.0 / np.sqrt(D)
    w = jax.random.uniform(kw, (D, D), jnp.float32, -bound, bound)
    bias = jax.random.uniform(kb, (D,), jnp.float32, -bound, bound)

    out = model_forward(x1, w, bias, x2)
    out = jax.block_until_ready(out)

    ref = reference_forward(x1, w, bias, x2)
    np.testing.assert_allclose(np.asarray(out), np.asarray(ref), rtol=1e-5, atol=1e-5)

    print("KERNEL_OK")
</pallas_src>

<mosaic_0001>
module attributes {stable_mosaic.version = 11 : i64} {
  func.func @fused_kernel(%arg0: memref<16x32xf32, #tpu.memory_space<vmem>>, %arg1: memref<32x32xf32, #tpu.memory_space<vmem>>, %arg2: memref<1x32xf32, #tpu.memory_space<vmem>>, %arg3: memref<64x32xf32, #tpu.memory_space<vmem>>, %arg4: memref<16x128xf32, #tpu.memory_space<vmem>>) attributes {dimension_semantics = [], scalar_prefetch = 0 : i64, scratch_operands = 0 : i64, tpu.core_type = #tpu.core_type<tc>} {
    %c0 = arith.constant 0 : index
    %c0_0 = arith.constant 0 : index
    %0 = vector.load %arg0[%c0, %c0_0] : memref<16x32xf32, #tpu.memory_space<vmem>>, vector<16x32xf32>
    %c0_1 = arith.constant 0 : index
    %c0_2 = arith.constant 0 : index
    %1 = vector.load %arg1[%c0_1, %c0_2] : memref<32x32xf32, #tpu.memory_space<vmem>>, vector<32x32xf32>
    %cst = arith.constant dense<0.000000e+00> : vector<16x32xf32>
    %2 = tpu.matmul %0, %1, %cst {dimension_numbers = #tpu.dot_dimension_numbers<[1], [1], [0], [0], [0, 0, 1, 0], [], []>} : vector<16x32xf32>, vector<32x32xf32>, vector<16x32xf32> -> vector<16x32xf32>
    %c0_3 = arith.constant 0 : index
    %c0_4 = arith.constant 0 : index
    %3 = vector.load %arg2[%c0_3, %c0_4] : memref<1x32xf32, #tpu.memory_space<vmem>>, vector<1x32xf32>
    %4 = vector.broadcast %3 : vector<1x32xf32> to vector<16x32xf32>
    %5 = arith.addf %2, %4 : vector<16x32xf32>
    %cst_5 = arith.constant 1.000000e-03 : f32
    %6 = vector.broadcast %cst_5 : f32 to vector<16x32xf32>
    %7 = arith.mulf %5, %6 : vector<16x32xf32>
    %c0_6 = arith.constant 0 : index
    %c0_7 = arith.constant 0 : index
    %8 = vector.load %arg3[%c0_6, %c0_7] : memref<64x32xf32, #tpu.memory_space<vmem>>, vector<64x32xf32>
    %cst_8 = arith.constant dense<0.000000e+00> : vector<64x16xf32>
    %9 = tpu.matmul %8, %7, %cst_8 {dimension_numbers = #tpu.dot_dimension_numbers<[1], [1], [0], [0], [0, 0, 1, 0], [], []>} : vector<64x32xf32>, vector<16x32xf32>, vector<64x16xf32> -> vector<64x16xf32>
    %cst_9 = arith.constant dense<0xFF800000> : vector<64xf32>
    %10 = vector.multi_reduction <maximumf>, %9, %cst_9 [1] : vector<64x16xf32> to vector<64xf32>
    %11 = vector.shape_cast %10 : vector<64xf32> to vector<64x1xf32>
    %12 = vector.broadcast %11 : vector<64x1xf32> to vector<64x16xf32>
    %13 = arith.subf %9, %12 : vector<64x16xf32>
    %14 = math.exp %13 : vector<64x16xf32>
    %cst_10 = arith.constant dense<0.000000e+00> : vector<64xf32>
    %15 = vector.multi_reduction <add>, %14, %cst_10 [1] : vector<64x16xf32> to vector<64xf32>
    %16 = vector.shape_cast %15 : vector<64xf32> to vector<64x1xf32>
    %17 = tpu.reciprocal %16 : vector<64x1xf32> -> vector<64x1xf32>
    %18 = vector.broadcast %17 : vector<64x1xf32> to vector<64x16xf32>
    %19 = arith.mulf %14, %18 : vector<64x16xf32>
    %20 = vector.extract_strided_slice %19 {offsets = [0, 0], sizes = [16, 16], strides = [1, 1]} : vector<64x16xf32> to vector<16x16xf32>
    %21 = vector.extract_strided_slice %8 {offsets = [0, 0], sizes = [16, 32], strides = [1, 1]} : vector<64x32xf32> to vector<16x32xf32>
    %cst_11 = arith.constant dense<0.000000e+00> : vector<16x32xf32>
    %22 = tpu.matmul %20, %21, %cst_11 {dimension_numbers = #tpu.dot_dimension_numbers<[1], [0], [0], [1], [0, 0, 1, 1], [], []>} : vector<16x16xf32>, vector<16x32xf32>, vector<16x32xf32> -> vector<16x32xf32>
    %23 = vector.extract_strided_slice %19 {offsets = [16, 0], sizes = [16, 16], strides = [1, 1]} : vector<64x16xf32> to vector<16x16xf32>
    %24 = vector.extract_strided_slice %8 {offsets = [16, 0], sizes = [16, 32], strides = [1, 1]} : vector<64x32xf32> to vector<16x32xf32>
    %cst_12 = arith.constant dense<0.000000e+00> : vector<16x32xf32>
    %25 = tpu.matmul %23, %24, %cst_12 {dimension_numbers = #tpu.dot_dimension_numbers<[1], [0], [0], [1], [0, 0, 1, 1], [], []>} : vector<16x16xf32>, vector<16x32xf32>, vector<16x32xf32> -> vector<16x32xf32>
    %26 = vector.extract_strided_slice %19 {offsets = [32, 0], sizes = [16, 16], strides = [1, 1]} : vector<64x16xf32> to vector<16x16xf32>
    %27 = vector.extract_strided_slice %8 {offsets = [32, 0], sizes = [16, 32], strides = [1, 1]} : vector<64x32xf32> to vector<16x32xf32>
    %cst_13 = arith.constant dense<0.000000e+00> : vector<16x32xf32>
    %28 = tpu.matmul %26, %27, %cst_13 {dimension_numbers = #tpu.dot_dimension_numbers<[1], [0], [0], [1], [0, 0, 1, 1], [], []>} : vector<16x16xf32>, vector<16x32xf32>, vector<16x32xf32> -> vector<16x32xf32>
    %29 = vector.extract_strided_slice %19 {offsets = [48, 0], sizes = [16, 16], strides = [1, 1]} : vector<64x16xf32> to vector<16x16xf32>
    %30 = vector.extract_strided_slice %8 {offsets = [48, 0], sizes = [16, 32], strides = [1, 1]} : vector<64x32xf32> to vector<16x32xf32>
    %cst_14 = arith.constant dense<0.000000e+00> : vector<16x32xf32>
    %31 = tpu.matmul %29, %30, %cst_14 {dimension_numbers = #tpu.dot_dimension_numbers<[1], [0], [0], [1], [0, 0, 1, 1], [], []>} : vector<16x16xf32>, vector<16x32xf32>, vector<16x32xf32> -> vector<16x32xf32>
    %32 = tpu.concatenate %22, %25, %28, %31 in 1 : vector<16x32xf32>, vector<16x32xf32>, vector<16x32xf32>, vector<16x32xf32> -> vector<16x128xf32>
    %c0_15 = arith.constant 0 : index
    %c0_16 = arith.constant 0 : index
    %33 = vector.load %arg4[%c0_15, %c0_16] : memref<16x128xf32, #tpu.memory_space<vmem>>, vector<16x128xf32>
    tpu.vector_store %arg4[%c0_15, %c0_16], %32 {strides = array<i32>} : memref<16x128xf32, #tpu.memory_space<vmem>>, vector<16x128xf32>,
    return
  }
}

</mosaic_0001>

<bundles_post_ra>
// kernel: tpu_custom_call.1
= control target key start
LH: loop header
LB: loop body
LE: loop exit
PB: predicated region body
PF: predicated region fallthrough
CT: control target
= control target key end

     0   :  { %vm31_vm0 = vcmask 261120   ;;  %s1052_s0 = inlined_call_operand.vmem [shape: f32[16,32], index: 0, kind: input, shape index: {}]   ;;  %s1053_s1 = inlined_call_operand.vmem [shape: f32[32,32], index: 1, kind: input, shape index: {}]   ;;  %s1054_s2 = inlined_call_operand.vmem [shape: f32[1,32], index: 2, kind: input, shape index: {}]   ;;  %s1055_s3 = inlined_call_operand.vmem [shape: f32[64,32], index: 3, kind: input, shape index: {}]   ;;  %s1056_s4 = inlined_call_operand.hbm [shape: f32[16,128], index: 4, kind: output, shape index: {}]  }
   0x1   :  { %v23_v0 = vld [vmem:[%s1053_s1 + $0x18] sm:$0xff]  ;;  %v22_v1 = vld [vmem:[%s1053_s1 + $0x10] sm:$0xff]  ;;  %v18_v2 = vld [vmem:[%s1052_s0] sm:$0xff] }
   0x2   :  { %790 = vmatprep.subr.msk.mxu0 %vm31_vm0, %v23_v0  ;;  %798 = vmatprep.mubr.msk.f32.mxu0 %vm31_vm0, %v18_v2 }
   0x3   :  { %791 = vmatpush3.xpose.msk.msra.mxu0 %vm31_vm0, %v23_v0 }
   0x4   :  { %9 = vsyncpa [#allocation3], 0  ;;  %792 = vmatprep.subr.msk.mxu0 %vm31_vm0, %v22_v1  ;;  %v21_v3 = vld [vmem:[%s1053_s1 + $0x8] sm:$0xff]  ;;  %v20_v4 = vld [vmem:[%s1053_s1] sm:$0xff]  ;;  %vm270_vm1 = vcmask 130048   ;;  %s906_s16 = smov 64  }
   0x5   :  { %v19_v5 = vld [vmem:[%s1052_s0 + $0x8] sm:$0xff]  ;;  %v127_v6 = vld [vmem:[%s1055_s3] sm:$0xff]  ;;  %v974_v8 = vld [vmem:[%s1055_s3 + $0x18] sm:$0xff]  ;;  %s907_s17 = smov 96   ;;  %vm709_vm2 = vcmask 523264   ;;  %vm712_vm3 = vcmask 785408  }
   0x6   :  { %v128_v7 = vld [vmem:[%s1055_s3 + $0x8] sm:$0xff]  ;;  %805 = vmatprep.mubr.msk.f32.mxu1 %vm31_vm0, %v127_v6  ;;  %v733_v9 = vld [vmem:[%s1054_s2] ss:$0 sm:$0xff]  ;;  %v990_v17 = vld [vmem:[%s1055_s3 + $0x10] sm:$0xff]  ;;  %s908_s18 = smov [#allocation2]  }
   0x7   :  { %793 = vmatpush3.xpose.msk.msra.mxu0 %vm31_vm0, %v22_v1  ;;  %v132_v16 = vld [vmem:[%s1055_s3 + $0x28] sm:$0xff]  ;;  %v131_v18 = vld [vmem:[%s1055_s3 + $0x20] sm:$0xff]  ;;  %v1004_v19 = vld [vmem:[%s1055_s3 + $0x30] sm:$0xff]  ;;  %s722_s19 = sshll.u32 %s908_s18, 4  ;;  %s723_s19 = int_to_ptr.vmem [resolvable:$true] %s722_s19 }
   0x8   :  { %794 = vmatprep.subr.msk.mxu0 %vm31_vm0, %v21_v3  ;;  %v1012_v20 = vld [vmem:[%s1055_s3 + $0x38] sm:$0xff]  ;;  %s905_s3 = smov 32   ;;  %s883_s20 = scalar_lea.vmem %s723_s19, 256 }
   0x9   :  { %p884_p0 = scmp.ne.s32.totalorder %s723_s19, %s883_s20  ;;  %p888_p1 = scmp.lt.s32.totalorder %s723_s19, %s723_s19 }
   0xa   :  { %p889_p2 = scmp.lt.s32.totalorder %s883_s20, %s883_s20 }
   0xb   :  { %795 = vmatpush3.xpose.msk.msra.mxu0 %vm31_vm0, %v21_v3 }
   0xc   :  { %796 = vmatprep.subr.msk.mxu0 %vm31_vm0, %v20_v4  ;;  %p890_p3 = por %p889_p2, %p888_p1 }
   0xe   :  { %p891_p4 = pnand %p890_p3, %p884_p0 }
   0xf   :  { %797 = vmatpush3.xpose.msk.msra.mxu0 %vm31_vm0, %v20_v4 }
  0x10   :  { %817 = vmatprep.subr.mxu0 %v128_v7 }
  0x12   :  { %799 = vmatmul.mubr.msk.f32.vlgmr.msra.gmra.mxu0 %vm31_vm0, %v19_v5 }
  0x13   :  { %818 = vmatpush3.msra.mxu0 %v128_v7 }
  0x14   :  { %819 = vmatprep.subr.mxu0 %v127_v6 }
  0x15   :  { %820 = vmatpush3.msra.mxu0 %v127_v6 }
  0x16   :  { %824 = vmatprep.subr.mxu0 %v974_v8 }
  0xd2   :  { %v800_v10 = vpop.f32.mrf.mxu0 }
  0xd3   :  { %v122_v11 = vadd.f32 %v800_v10, %v733_v9 }
  0xd4   :  { %v116_v12 = vpop.f32.mrf.mxu0 }
  0xd5   :  { %v126_v13 = vmul.f32 0.001, %v122_v11  ;;  %v117_v14 = vadd.f32 %v733_v9, %v116_v12 }
  0xd7   :  { %v125_v15 = vmul.f32 0.001, %v117_v14  ;;  %801 = vmatprep.subr.msk.mxu1 %vm31_vm0, %v126_v13 }
  0xd8   :  { %802 = vmatpush3.xpose.msk.msra.mxu1 %vm31_vm0, %v126_v13 }
  0xd9   :  { %803 = vmatprep.subr.msk.mxu1 %vm31_vm0, %v125_v15 }
  0xdc   :  { %804 = vmatpush3.xpose.msk.msra.mxu1 %vm31_vm0, %v125_v15 }
  0xdd   :  { %831 = vmatprep.subr.mxu1 %v132_v16 }
  0xdf   :  { %806 = vmatmul.mubr.msk.f32.vlgmr.msra.gmra.mxu1 %vm31_vm0, %v128_v7 }
  0xe0   :  { %808 = vmatprep.mubr.msk.f32.mxu1 %vm31_vm0, %v990_v17  ;;  %832 = vmatpush3.msra.mxu1 %v132_v16 }
  0xe1   :  { %833 = vmatprep.subr.mxu1 %v131_v18 }
  0xe2   :  { %834 = vmatpush3.msra.mxu1 %v131_v18 }
  0xe3   :  { %809 = vmatmul.mubr.msk.f32.gmra.mxu1 %vm31_vm0, %v974_v8 }
  0xe4   :  { %811 = vmatprep.mubr.msk.f32.mxu1 %vm31_vm0, %v131_v18 }
  0xe7   :  { %812 = vmatmul.mubr.msk.f32.gmra.mxu1 %vm31_vm0, %v132_v16 }
  0xe8   :  { %814 = vmatprep.mubr.msk.f32.mxu1 %vm31_vm0, %v1004_v19 }
  0xeb   :  { %815 = vmatmul.mubr.msk.f32.gmra.mxu1 %vm31_vm0, %v1012_v20 }
 0x19f   :  { %v807_v21 = vpop.f32.mrf.mxu1 }
 0x1a0   :  { %v274_v22 = vsel %vm270_vm1, %v807_v21, -inf }
 0x1a1   :  { %275 = vmax.xlane.f32.xlu0 %v274_v22  ;;  %v231_v23 = vpop.f32.mrf.mxu1 }
 0x1a2   :  { %v271_v25 = vsel %vm270_vm1, %v231_v23, -inf }
 0x1a3   :  { %v810_v24 = vpop.f32.mrf.mxu1 }
 0x1a4   :  { %v280_v26 = vsel %vm270_vm1, %v810_v24, -inf }
 0x1a5   :  { %272 = vmax.xlane.f32.xlu0 %v271_v25  ;;  %281 = vmax.xlane.f32.xlu1 %v280_v26  ;;  %v241_v27 = vpop.f32.mrf.mxu1 }
 0x1a6   :  { %v277_v29 = vsel %vm270_vm1, %v241_v27, -inf }
 0x1a7   :  { %v813_v28 = vpop.f32.mrf.mxu1 }
 0x1a8   :  { %v286_v33 = vsel %vm270_vm1, %v813_v28, -inf }
 0x1a9   :  { %278 = vmax.xlane.f32.xlu1 %v277_v29  ;;  %v251_v30 = vpop.f32.mrf.mxu1 }
 0x1aa   :  { %v283_v31 = vsel %vm270_vm1, %v251_v30, -inf }
 0x1ab   :  { %284 = vmax.xlane.f32.xlu0 %v283_v31  ;;  %v816_v32 = vpop.f32.mrf.mxu1 }
 0x1ac   :  { %v292_v36 = vsel %vm270_vm1, %v816_v32, -inf }
 0x1ad   :  { %287 = vmax.xlane.f32.xlu1 %v286_v33  ;;  %v261_v34 = vpop.f32.mrf.mxu1 }
 0x1ae   :  { %v289_v35 = vsel %vm270_vm1, %v261_v34, -inf }
 0x1af   :  { %290 = vmax.xlane.f32.xlu0 %v289_v35 }
 0x1b1   :  { %293 = vmax.xlane.f32.xlu1 %v292_v36 }
 0x22a   :  { %v276_v37 = vpop.xlane.xlu0 %275 }
 0x22b   :  { %v296_v38 = vsub.f32 %v807_v21, %v276_v37 }
 0x22d   :  { %v305_v39 = vmul.f32 1.442695, %v296_v38 }
 0x22e   :  { %v273_v40 = vpop.xlane.xlu0 %272  ;;  %v282_v41 = vpop.xlane.xlu1 %281 }
 0x22f   :  { %851 = vpow2.f32 %v305_v39  ;;  %v295_v42 = vsub.f32 %v231_v23, %v273_v40  ;;  %v298_v43 = vsub.f32 %v810_v24, %v282_v41 }
 0x231   :  { %v303_v44 = vmul.f32 1.442695, %v295_v42  ;;  %v309_v45 = vmul.f32 1.442695, %v298_v43 }
 0x232   :  { %v279_v46 = vpop.xlane.xlu1 %278 }
 0x233   :  { %853 = vpow2.f32 %v303_v44  ;;  %v297_v47 = vsub.f32 %v241_v27, %v279_v46 }
 0x234   :  { %855 = vpow2.f32 %v309_v45  ;;  %v285_v48 = vpop.xlane.xlu0 %284 }
 0x235   :  { %v307_v49 = vmul.f32 1.442695, %v297_v47  ;;  %v299_v50 = vsub.f32 %v251_v30, %v285_v48 }
 0x236   :  { %v288_v51 = vpop.xlane.xlu1 %287 }
 0x237   :  { %857 = vpow2.f32 %v307_v49  ;;  %v311_v52 = vmul.f32 1.442695, %v299_v50  ;;  %v300_v53 = vsub.f32 %v813_v28, %v288_v51 }
 0x238   :  { %v291_v54 = vpop.xlane.xlu0 %290 }
 0x239   :  { %859 = vpow2.f32 %v311_v52  ;;  %v313_v55 = vmul.f32 1.442695, %v300_v53  ;;  %v301_v56 = vsub.f32 %v261_v34, %v291_v54 }
 0x23a   :  { %v294_v57 = vpop.xlane.xlu1 %293 }
 0x23b   :  { %861 = vpow2.f32 %v313_v55  ;;  %v315_v58 = vmul.f32 1.442695, %v301_v56  ;;  %v302_v59 = vsub.f32 %v816_v32, %v294_v57 }
 0x23c   :  { %v852_v60 = vpop.eup %851 }
 0x23d   :  { %863 = vpow2.f32 %v315_v58  ;;  %v317_v61 = vmul.f32 1.442695, %v302_v59  ;;  %v322_v62 = vsel %vm270_vm1, %v852_v60, 0.0 }
 0x23e   :  { %323 = vadd.xlane.f32.xlu1 %v322_v62 }
 0x23f   :  { %865 = vpow2.f32 %v317_v61 }
 0x240   :  { %v854_v63 = vpop.eup %853 }
 0x241   :  { %v856_v0 = vpop.eup %855  ;;  %v319_v1 = vsel %vm270_vm1, %v854_v63, 0.0 }
 0x242   :  { %v328_v2 = vsel %vm270_vm1, %v856_v0, 0.0  ;;  %320 = vadd.xlane.f32.xlu0 %v319_v1 }
 0x243   :  { %329 = vadd.xlane.f32.xlu1 %v328_v2 }
 0x244   :  { %v858_v3 = vpop.eup %857 }
 0x245   :  { %v325_v4 = vsel %vm270_vm1, %v858_v3, 0.0 }
 0x246   :  { %v860_v5 = vpop.eup %859  ;;  %326 = vadd.xlane.f32.xlu0 %v325_v4 }
 0x247   :  { %v331_v9 = vsel %vm270_vm1, %v860_v5, 0.0 }
 0x248   :  { %v862_v6 = vpop.eup %861 }
 0x249   :  { %v334_v7 = vsel %vm270_vm1, %v862_v6, 0.0 }
 0x24a   :  { %v864_v10 = vpop.eup %863  ;;  %335 = vadd.xlane.f32.xlu1 %v334_v7  ;;  %332 = vadd.xlane.f32.xlu0 %v331_v9 }
 0x24b   :  { %v337_v13 = vsel %vm270_vm1, %v864_v10, 0.0 }
 0x24c   :  { %v866_v11 = vpop.eup %865 }
 0x24d   :  { %v340_v12 = vsel %vm270_vm1, %v866_v11, 0.0 }
 0x24e   :  { %341 = vadd.xlane.f32.xlu1 %v340_v12  ;;  %338 = vadd.xlane.f32.xlu0 %v337_v13 }
 0x2c7   :  { %v324_v14 = vpop.xlane.xlu1 %323 }
 0x2c8   :  { %867 = vrcp.f32 %v324_v14 }
 0x2cb   :  { %v321_v15 = vpop.xlane.xlu0 %320 }
 0x2cc   :  { %v330_v16 = vpop.xlane.xlu1 %329  ;;  %869 = vrcp.f32 %v321_v15 }
 0x2cd   :  { %871 = vrcp.f32 %v330_v16 }
 0x2cf   :  { %v327_v18 = vpop.xlane.xlu0 %326 }
 0x2d0   :  { %873 = vrcp.f32 %v327_v18 }
 0x2d3   :  { %v336_v21 = vpop.xlane.xlu1 %335  ;;  %v333_v22 = vpop.xlane.xlu0 %332 }
 0x2d4   :  { %875 = vrcp.f32 %v336_v21 }
 0x2d5   :  { %877 = vrcp.f32 %v333_v22  ;;  %v868_v25 = vpop.eup %867 }
 0x2d6   :  { %v352_v28 = vmul.f32 %v868_v25, %v852_v60 }
 0x2d7   :  { %v342_v23 = vpop.xlane.xlu1 %341  ;;  %v339_v24 = vpop.xlane.xlu0 %338 }
 0x2d8   :  { %879 = vrcp.f32 %v342_v23 }
 0x2d9   :  { %v870_v26 = vpop.eup %869  ;;  %881 = vrcp.f32 %v339_v24 }
 0x2da   :  { %v351_v27 = vmul.f32 %v870_v26, %v854_v63  ;;  %v872_v29 = vpop.eup %871 }
 0x2db   :  { %v354_v32 = vmul.f32 %v872_v29, %v856_v0 }
 0x2dc   :  { %821 = vmatprep.mubr.msk.f32.mxu0 %vm270_vm1, %v351_v27 }
 0x2dd   :  { %v874_v30 = vpop.eup %873  ;;  %822 = vmatmul.mubr.msk.f32.vlgmr.msra.gmra.mxu0 %vm270_vm1, %v352_v28 }
 0x2de   :  { %825 = vmatpush3.msra.mxu0 %v974_v8  ;;  %v353_v31 = vmul.f32 %v874_v30, %v858_v3 }
 0x2df   :  { %826 = vmatprep.subr.mxu0 %v990_v17 }
 0x2e0   :  { %827 = vmatpush3.msra.mxu0 %v990_v17  ;;  %828 = vmatprep.mubr.msk.f32.mxu0 %vm270_vm1, %v353_v31 }
 0x2e1   :  { %v876_v33 = vpop.eup %875  ;;  %829 = vmatmul.mubr.msk.f32.vlgmr.msra.gmra.mxu0 %vm270_vm1, %v354_v32  ;;  %838 = vmatprep.subr.mxu0 %v1012_v20 }
 0x2e2   :  { %v878_v34 = vpop.eup %877  ;;  %v356_v35 = vmul.f32 %v876_v33, %v862_v6  ;;  %839 = vmatpush3.msra.mxu0 %v1012_v20 }
 0x2e3   :  { %v355_v36 = vmul.f32 %v878_v34, %v860_v5  ;;  %840 = vmatprep.subr.mxu0 %v1004_v19 }
 0x2e4   :  { %841 = vmatpush3.msra.mxu0 %v1004_v19 }
 0x2e5   :  { %v880_v8 = vpop.eup %879  ;;  %835 = vmatprep.mubr.msk.f32.mxu1 %vm270_vm1, %v355_v36 }
 0x2e6   :  { %v882_v17 = vpop.eup %881  ;;  %836 = vmatmul.mubr.msk.f32.vlgmr.msra.gmra.mxu1 %vm270_vm1, %v356_v35  ;;  %v358_v37 = vmul.f32 %v880_v8, %v866_v11 }
 0x2e7   :  { %v357_v38 = vmul.f32 %v882_v17, %v864_v10 }
 0x2e9   :  { %842 = vmatprep.mubr.msk.f32.mxu0 %vm270_vm1, %v357_v38 }
 0x2ea   :  { %843 = vmatmul.mubr.msk.f32.vlgmr.msra.gmra.mxu0 %vm270_vm1, %v358_v37 }
 0x39d   :  { %v823_v39 = vpop.f32.mrf.mxu0 }
 0x39f   :  { %v431_v40 = vpop.f32.mrf.mxu0 }
 0x3a1   :  { %v830_v20 = vpop.f32.mrf.mxu0 }
 0x3a2   :  { %687 = vrot.lane.b32.xlu1 %v830_v20, %s905_s3 }
 0x3a3   :  { %v512_v41 = vpop.f32.mrf.mxu0 }
 0x3a4   :  { %685 = vrot.lane.b32.xlu0 %v512_v41, %s905_s3 }
 0x3a6   :  { %v837_v19 = vpop.f32.mrf.mxu1 }
 0x3a7   :  { %695 = vrot.lane.b32.xlu1 %v837_v19, %s906_s16 }
 0x3a8   :  { %v593_v42 = vpop.f32.mrf.mxu1 }
 0x3aa   :  { %v844_v43 = vpop.f32.mrf.mxu0 }
 0x3ab   :  { %693 = vrot.lane.b32.xlu1 %v593_v42, %s906_s16 }
 0x3ac   :  { %v674_v44 = vpop.f32.mrf.mxu0 }
 0x3ad   :  { %701 = vrot.lane.b32.xlu0 %v674_v44, %s907_s17 }
 0x3af   :  { %703 = vrot.lane.b32.xlu1 %v844_v43, %s907_s17 }
 0x414   :  { %v688_v45 = vpop.permute.xlu1 %687 }
 0x415   :  { %v708_v52 = vsel %vm31_vm0, %v823_v39, %v688_v45 }
 0x416   :  { %v686_v47 = vpop.permute.xlu0 %685 }
 0x417   :  { %v707_v48 = vsel %vm31_vm0, %v431_v40, %v686_v47 }
 0x419   :  { %v696_v46 = vpop.permute.xlu1 %695 }
 0x41a   :  { %v711_v54 = vsel %vm709_vm2, %v708_v52, %v696_v46 }
 0x41d   :  { %v694_v49 = vpop.permute.xlu1 %693 }
 0x41e   :  { %v710_v50 = vsel %vm709_vm2, %v707_v48, %v694_v49 }
 0x41f   :  { %v702_v51 = vpop.permute.xlu0 %701 }
 0x420   :  { %v713_v53 = vsel %vm712_vm3, %v710_v50, %v702_v51 }
 0x421   :  { %715 = vst [vmem:[#allocation2] sm:$0xff] %v713_v53  ;;  %v704_v55 = vpop.permute.xlu1 %703 }
 0x422   :  { %v714_v56 = vsel %vm712_vm3, %v711_v54, %v704_v55 }
 0x423   :  { %716 = vst [vmem:[#allocation2 + $0x8] sm:$0xff] %v714_v56 }
 0x424   :  { %894 = shalt.err (!%p891_p4)
}
 0x425   :  { %s909_s21 = smov 128   ;;  %s910_s22 = smov 8  }
 0x426   :  { %728 = dma.vmem_to_hbm [thread:$0]  %s723_s19, 256, %s1056_s4, [#allocation3], %s909_s21, %s909_s21, %s910_s22  }
 0x427   :  { %903 = dma.done.wait [#allocation3], 256  }
 0x428   :  { %904 = vsyncadd [#allocation3], 4294967040 }
 0x429   :  { %732 = vsyncpa [#allocation3], 1 }

</bundles_post_ra>
